<compile_context>
chip_gen: v7x
topology: tpu7x:2x2x1
jax: 0.10.0
libtpu: 0.0.40
codegen_flags: <defaults>
</compile_context>

<pallas_src>
import functools
import math

import jax
import jax.numpy as jnp
from jax import lax
from jax.experimental import pallas as pl
from jax.experimental.pallas import tpu as pltpu

LANE = 128
_ACC_LANES = 512                 # inner-chunk width: 4 f32 vreg columns -> independent VALU chains
_DEFAULT_BLOCK_BYTES = 8 << 20   # ~8 MiB grads tile (16 MiB double-buffered); v7x could use 16 MiB


def _round_up(x, m):
    return (x + m - 1) // m * m


def _cdiv(a, b):
    return -(-a // b)


def _sumsq_kernel(g_ref, out_ref, acc_ref, *, num_tasks, fold, tile, chunk, df, need_mask):
    """Per-task partial sum of squares over this core's slice of the D axis."""
    c = pl.program_id(0)          # core-split axis ("parallel")
    k = pl.program_id(1)          # D-tile sweep ("arbitrary" / reduction)
    nk = pl.num_programs(1)

    @pl.when(k == 0)
    def _():
        acc_ref[...] = jnp.zeros_like(acc_ref)

    rows = acc_ref.shape[0]                      # TF = num_tasks * fold
    n_chunks = tile // chunk

    if need_mask:
        # First folded-grads column covered by this tile; columns >= df are
        # out-of-bounds lanes of a ragged block (Pallas does NOT zero-fill partial
        # blocks) and must be zeroed before squaring.  Also zeroes the re-read
        # dummy tile when the tile count does not split evenly across cores.
        limit = df - (c * nk + k) * tile
        col = lax.broadcasted_iota(jnp.int32, (rows, chunk), 1)

    def body(i, p):
        start = pl.multiple_of(i * chunk, chunk)
        blk = g_ref[:, pl.ds(start, chunk)].astype(jnp.float32)
        if need_mask:
            blk = jnp.where(col < (limit - start), blk, 0.0)
        return p + blk * blk

    partial = lax.fori_loop(0, n_chunks, body,
                            jnp.zeros((rows, chunk), jnp.float32),
                            unroll=min(8, n_chunks))
    acc_ref[...] += partial

    @pl.when(k == nk - 1)
    def _():
        acc = acc_ref[...]                                        # (TF, chunk) f32
        lane = lax.broadcasted_iota(jnp.int32, (1, LANE), 1)
        vec = jnp.zeros((1, LANE), jnp.float32)
        for t in range(num_tasks):                                # T is small; static unroll
            s_t = jnp.sum(acc[t * fold:(t + 1) * fold, :], keepdims=True)   # (1, 1)
            vec = jnp.where(lane == t, s_t, vec)
        out_ref[0] = vec                                          # this core's (1, 128) slot


def _gradnorm_epilogue_kernel(losses_ref, part_ref, out_ref, *, alpha, num_tasks, nsplit):
    """Combine per-core partial sums of squares and do the GradNorm scalar math."""
    ss = part_ref[0]                                              # (1, LANE) f32
    for c in range(1, nsplit):
        ss = ss + part_ref[c]
    lane = lax.broadcasted_iota(jnp.int32, (1, LANE), 1)
    tmask = lane < num_tasks
    inv_t = 1.0 / num_tasks

    grad_norms = jnp.sqrt(ss)                                     # lanes >= T hold sqrt(0) = 0
    mean_gn = jnp.sum(jnp.where(tmask, grad_norms, 0.0), keepdims=True) * inv_t   # (1, 1)

    lvec = jnp.zeros((1, LANE), jnp.float32)
    for t in range(num_tasks):                                    # lift SMEM scalars into lanes
        lvec = jnp.where(lane == t, losses_ref[t], lvec)
    mean_l = jnp.sum(jnp.where(tmask, lvec, 0.0), keepdims=True) * inv_t           # (1, 1)

    # loss_ratios ** alpha via exp(alpha*log(ratio)): assumes losses > 0, the same
    # domain restriction as the torch reference's real-exponent pow.
    ratio = jnp.where(tmask, lvec / mean_l, 1.0)
    target = mean_gn * jnp.exp(alpha * jnp.log(ratio))
    diff = jnp.abs(grad_norms - target)
    out_ref[...] = jnp.sum(jnp.where(tmask, diff, 0.0), keepdims=True)             # (1, 1)


def gradnorm_loss_pallas(losses, grads_matrix, alpha=1.5, *, max_block_lanes=None):
    """losses: (T,) ; grads_matrix: (T, D) float (f32/bf16) -> scalar grad_loss."""
    T, D = grads_matrix.shape
    assert T <= LANE, "epilogue packs per-task scalars into a single 128-lane vreg"
    if grads_matrix.dtype not in (jnp.float32, jnp.bfloat16):
        grads_matrix = grads_matrix.astype(jnp.float32)
    losses = losses.reshape(T).astype(jnp.float32)
    itemsize = jnp.dtype(grads_matrix.dtype).itemsize

    # --- dtype-aware sublane fold (8 rows/vreg f32, 16 bf16) ----------------------
    pack = 32 // itemsize
    fold = 0
    for f in range(1, pack + 1):                  # smallest exact fill keeps TF minimal
        if D % f == 0 and (T * f) % pack == 0:
            fold = f
            break
    if fold == 0:
        # No exact sublane fill possible (e.g. odd T with indivisible D): fall back to
        # the largest fold dividing D.  Correct; partially filled sublanes (accepted).
        fold = max(f for f in range(1, pack + 1) if D % f == 0)
    TF, Df = T * fold, D // fold
    g = grads_matrix.reshape(TF, Df)              # free row-major regroup; no HBM copy

    # --- tiling -------------------------------------------------------------------
    if max_block_lanes is None:
        max_block_lanes = max(LANE, _DEFAULT_BLOCK_BYTES // (TF * itemsize))
    tile = max(LANE, min(int(max_block_lanes), _round_up(Df, LANE)) // LANE * LANE)
    chunk = _ACC_LANES
    while tile % chunk:
        chunk //= 2                               # 512 -> 256 -> 128 (tile is a 128-multiple)
    num_tiles = _cdiv(Df, tile)
    nsplit = 2 if num_tiles >= 2 else 1           # v7x: half the sweep per TensorCore
    tiles_per_split = _cdiv(num_tiles, nsplit)
    need_mask = (Df % tile != 0) or (num_tiles % nsplit != 0)

    def g_index_map(c, k):
        # Clamp the dummy step of an uneven split onto the last real tile; its
        # contribution is zeroed by the in-kernel mask.
        return (0, jnp.minimum(c * tiles_per_split + k, num_tiles - 1))

    block_bytes = TF * tile * itemsize
    vmem_limit = int(min(48 << 20, 2 * block_bytes + TF * chunk * 4 + (8 << 20)))

    sweep = functools.partial(_sumsq_kernel, num_tasks=T, fold=fold, tile=tile,
                              chunk=chunk, df=Df, need_mask=need_mask)
    partials = pl.pallas_call(
        sweep,
        out_shape=jax.ShapeDtypeStruct((nsplit, 1, LANE), jnp.float32),
        grid=(nsplit, tiles_per_split),
        in_specs=[pl.BlockSpec((TF, tile), g_index_map)],
        out_specs=pl.BlockSpec((1, 1, LANE), lambda c, k: (c, 0, 0)),
        scratch_shapes=[pltpu.VMEM((TF, chunk), jnp.float32)],
        compiler_params=pltpu.CompilerParams(
            dimension_semantics=("parallel", "arbitrary"),
            vmem_limit_bytes=vmem_limit),
        cost_estimate=pl.CostEstimate(
            flops=2 * T * D, transcendentals=0,
            bytes_accessed=T * D * itemsize + nsplit * LANE * 4),
    )(g)

    epilogue = functools.partial(_gradnorm_epilogue_kernel, alpha=float(alpha),
                                 num_tasks=T, nsplit=nsplit)
    out = pl.pallas_call(
        epilogue,
        out_shape=jax.ShapeDtypeStruct((1, 1), jnp.float32),
        grid=(1,),
        in_specs=[pl.BlockSpec(memory_space=pltpu.MemorySpace.SMEM),        # losses (T,)
                  pl.BlockSpec((nsplit, 1, LANE), lambda i: (0, 0, 0))],    # partials
        out_specs=pl.BlockSpec((1, 1), lambda i: (0, 0)),
        cost_estimate=pl.CostEstimate(flops=16 * T, transcendentals=3 * T,
                                      bytes_accessed=nsplit * LANE * 4 + T * 4 + 4),
    )(losses, partials)
    return out[0, 0]


if __name__ == "__main__":
    key = jax.random.PRNGKey(0)
    kp, kx, ky, kb, kc = jax.random.split(key, 5)

    def ref_grad_loss(ls, Gm, alpha):
        gn = jnp.sqrt(jnp.sum(Gm.astype(jnp.float32) ** 2, axis=1))
        lr = ls / jnp.mean(ls)
        return jnp.sum(jnp.abs(gn - jnp.mean(gn) * lr ** alpha))

    # ---- Test A: full GradNormLoss(num_tasks=4, alpha=1.5) pipeline ---------------
    NUM_TASKS, ALPHA = 4, 1.5
    PARAM_SHAPE = (8, 512)                       # one shared param group per task; D = 4096

    shared_params = [0.1 * jax.random.normal(jax.random.fold_in(kp, i), PARAM_SHAPE, jnp.float32)
                     for i in range(NUM_TASKS)]
    xs = [jax.random.normal(jax.random.fold_in(kx, i), PARAM_SHAPE, jnp.float32)
          for i in range(NUM_TASKS)]
    ys = jax.random.normal(ky, (NUM_TASKS,), jnp.float32)
    weights = jnp.ones((NUM_TASKS,), jnp.float32)        # nn.Parameter(torch.ones(num_tasks))

    def per_task_losses(params):
        return jnp.stack([(jnp.sum(params[i] * xs[i]) - ys[i]) ** 2 + 0.1
                          for i in range(NUM_TASKS)])    # strictly positive losses

    losses = per_task_losses(shared_params)
    # TODO(synk): torch.autograd.grad(create_graph=True) has no Pallas equivalent; the
    # gradient of the weighted loss wrt the shared params is wrapper glue via jax.grad.
    grads = jax.grad(lambda ps: jnp.sum(weights * per_task_losses(ps)))(shared_params)
    G = jnp.stack([g_.reshape(-1) for g_ in grads], axis=0)                  # (T, D) f32

    # small max_block_lanes so the demo exercises the multi-tile, two-way-split grid
    out_a = jax.block_until_ready(gradnorm_loss_pallas(losses, G, ALPHA, max_block_lanes=512))
    ref_a = ref_grad_loss(losses, G, ALPHA)
    assert jnp.allclose(out_a, ref_a, rtol=1e-4, atol=1e-3), (out_a, ref_a)

    # ---- Test B: ragged D (in-kernel masked last tile, no wrapper padding) --------
    Tb, Db = 3, 1000
    Gb = jax.random.normal(kb, (Tb, Db), jnp.float32)
    lb = jax.random.uniform(jax.random.fold_in(kb, 1), (Tb,), jnp.float32, 0.2, 2.0)
    out_b = jax.block_until_ready(gradnorm_loss_pallas(lb, Gb, ALPHA))
    ref_b = ref_grad_loss(lb, Gb, ALPHA)
    assert jnp.allclose(out_b, ref_b, rtol=1e-4, atol=1e-3), (out_b, ref_b)

    # ---- Test C: bf16 grads (16-row sublane fold, multi-chunk inner loop) ---------
    Tc, Dc = 2, 8192
    Gc = jax.random.normal(kc, (Tc, Dc), jnp.float32).astype(jnp.bfloat16)
    lc = jax.random.uniform(jax.random.fold_in(kc, 1), (Tc,), jnp.float32, 0.2, 2.0)
    out_c = jax.block_until_ready(gradnorm_loss_pallas(lc, Gc, ALPHA))
    ref_c = ref_grad_loss(lc, Gc, ALPHA)
    assert jnp.allclose(out_c, ref_c, rtol=5e-3, atol=5e-3), (out_c, ref_c)

    print("KERNEL_OK")
</pallas_src>

<mosaic_0001>
module attributes {stable_mosaic.version = 11 : i64} {
  func.func @_sumsq_kernel(%arg0: i32, %arg1: i32, %arg2: memref<8x512xf32, #tpu.memory_space<vmem>>, %arg3: memref<1x1x128xf32, #tpu.memory_space<vmem>>, %arg4: memref<8x512xf32, #tpu.memory_space<vmem>>) attributes {dimension_semantics = [#tpu.dimension_semantics<parallel>, #tpu.dimension_semantics<arbitrary>], iteration_bounds = array<i64: 2, 2>, scalar_prefetch = 0 : i64, scratch_operands = 1 : i64, tpu.core_type = #tpu.core_type<tc>, window_params = [{transform_indices = @transform_0, window_bounds = array<i64: 8, 512>}, {transform_indices = @transform_1, window_bounds = array<i64: 1, 1, 128>}]} {
    %c0_i32 = arith.constant 0 : i32
    %0 = arith.cmpi eq, %arg1, %c0_i32 : i32
    %1 = arith.extui %0 : i1 to i32
    %c0_i32_0 = arith.constant 0 : i32
    %2 = arith.cmpi ne, %1, %c0_i32_0 : i32
    scf.if %2 {
      %cst_8 = arith.constant 0.000000e+00 : f32
      %16 = vector.broadcast %cst_8 : f32 to vector<8x512xf32>
      %c0_9 = arith.constant 0 : index
      %c0_10 = arith.constant 0 : index
      %17 = vector.load %arg4[%c0_9, %c0_10] : memref<8x512xf32, #tpu.memory_space<vmem>>, vector<8x512xf32>
      tpu.vector_store %arg4[%c0_9, %c0_10], %16 {strides = array<i32>} : memref<8x512xf32, #tpu.memory_space<vmem>>, vector<8x512xf32>,
    } else {
    }
    %cst = arith.constant 0.000000e+00 : f32
    %3 = vector.broadcast %cst : f32 to vector<8x512xf32>
    %c0_i32_1 = arith.constant 0 : i32
    %c512_i32 = arith.constant 512 : i32
    %4 = arith.muli %c0_i32_1, %c512_i32 : i32
    %5 = tpu.assume_multiple %4, 512 : i32
    %c0 = arith.constant 0 : index
    %6 = arith.index_cast %5 : i32 to index
    %7 = vector.load %arg2[%c0, %6] : memref<8x512xf32, #tpu.memory_space<vmem>>, vector<8x512xf32>
    %8 = arith.mulf %7, %7 : vector<8x512xf32>
    %9 = arith.addf %3, %8 : vector<8x512xf32>
    %c1_i32 = arith.constant 1 : i32
    %c0_2 = arith.constant 0 : index
    %c0_3 = arith.constant 0 : index
    %10 = vector.load %arg4[%c0_2, %c0_3] : memref<8x512xf32, #tpu.memory_space<vmem>>, vector<8x512xf32>
    %11 = arith.addf %10, %9 : vector<8x512xf32>
    %c0_4 = arith.constant 0 : index
    %c0_5 = arith.constant 0 : index
    %12 = vector.load %arg4[%c0_4, %c0_5] : memref<8x512xf32, #tpu.memory_space<vmem>>, vector<8x512xf32>
    tpu.vector_store %arg4[%c0_4, %c0_5], %11 {strides = array<i32>} : memref<8x512xf32, #tpu.memory_space<vmem>>, vector<8x512xf32>,
    %c1_i32_6 = arith.constant 1 : i32
    %13 = arith.cmpi eq, %arg1, %c1_i32_6 : i32
    %14 = arith.extui %13 : i1 to i32
    %c0_i32_7 = arith.constant 0 : i32
    %15 = arith.cmpi ne, %14, %c0_i32_7 : i32
    scf.if %15 {
      %c0_8 = arith.constant 0 : index
      %c0_9 = arith.constant 0 : index
      %16 = vector.load %arg4[%c0_8, %c0_9] : memref<8x512xf32, #tpu.memory_space<vmem>>, vector<8x512xf32>
      %17 = tpu.iota {dimensions = array<i32: 1>} : vector<1x128xi32>
      %cst_10 = arith.constant 0.000000e+00 : f32
      %18 = vector.broadcast %cst_10 : f32 to vector<1x128xf32>
      %19 = vector.extract_strided_slice %16 {offsets = [0, 0], sizes = [2, 512], strides = [1, 1]} : vector<8x512xf32> to vector<2x512xf32>
      %20 = vector.shape_cast %19 : vector<2x512xf32> to vector<1x2x512xf32>
      %cst_11 = arith.constant dense<0.000000e+00> : vector<1xf32>
      %21 = vector.multi_reduction <add>, %20, %cst_11 [1, 2] : vector<1x2x512xf32> to vector<1xf32>
      %22 = vector.shape_cast %21 : vector<1xf32> to vector<1x1x1xf32>
      %23 = vector.extract %22[0, 0, 0] : f32 from vector<1x1x1xf32>
      %24 = vector.broadcast %23 : f32 to vector<1x1xf32>
      %c0_i32_12 = arith.constant 0 : i32
      %25 = vector.broadcast %c0_i32_12 : i32 to vector<1x128xi32>
      %26 = arith.cmpi eq, %17, %25 : vector<1x128xi32>
      %27 = vector.shape_cast %24 : vector<1x1xf32> to vector<1x1xf32>
      %28 = vector.broadcast %27 : vector<1x1xf32> to vector<1x128xf32>
      %29 = arith.select %26, %28, %18 : vector<1x128xi1>, vector<1x128xf32>
      %30 = vector.extract_strided_slice %16 {offsets = [2, 0], sizes = [2, 512], strides = [1, 1]} : vector<8x512xf32> to vector<2x512xf32>
      %31 = vector.shape_cast %30 : vector<2x512xf32> to vector<1x2x512xf32>
      %cst_13 = arith.constant dense<0.000000e+00> : vector<1xf32>
      %32 = vector.multi_reduction <add>, %31, %cst_13 [1, 2] : vector<1x2x512xf32> to vector<1xf32>
      %33 = vector.shape_cast %32 : vector<1xf32> to vector<1x1x1xf32>
      %34 = vector.extract %33[0, 0, 0] : f32 from vector<1x1x1xf32>
      %35 = vector.broadcast %34 : f32 to vector<1x1xf32>
      %c1_i32_14 = arith.constant 1 : i32
      %36 = vector.broadcast %c1_i32_14 : i32 to vector<1x128xi32>
      %37 = arith.cmpi eq, %17, %36 : vector<1x128xi32>
      %38 = vector.shape_cast %35 : vector<1x1xf32> to vector<1x1xf32>
      %39 = vector.broadcast %38 : vector<1x1xf32> to vector<1x128xf32>
      %40 = arith.select %37, %39, %29 : vector<1x128xi1>, vector<1x128xf32>
      %41 = vector.extract_strided_slice %16 {offsets = [4, 0], sizes = [2, 512], strides = [1, 1]} : vector<8x512xf32> to vector<2x512xf32>
      %42 = vector.shape_cast %41 : vector<2x512xf32> to vector<1x2x512xf32>
      %cst_15 = arith.constant dense<0.000000e+00> : vector<1xf32>
      %43 = vector.multi_reduction <add>, %42, %cst_15 [1, 2] : vector<1x2x512xf32> to vector<1xf32>
      %44 = vector.shape_cast %43 : vector<1xf32> to vector<1x1x1xf32>
      %45 = vector.extract %44[0, 0, 0] : f32 from vector<1x1x1xf32>
      %46 = vector.broadcast %45 : f32 to vector<1x1xf32>
      %c2_i32 = arith.constant 2 : i32
      %47 = vector.broadcast %c2_i32 : i32 to vector<1x128xi32>
      %48 = arith.cmpi eq, %17, %47 : vector<1x128xi32>
      %49 = vector.shape_cast %46 : vector<1x1xf32> to vector<1x1xf32>
      %50 = vector.broadcast %49 : vector<1x1xf32> to vector<1x128xf32>
      %51 = arith.select %48, %50, %40 : vector<1x128xi1>, vector<1x128xf32>
      %52 = vector.extract_strided_slice %16 {offsets = [6, 0], sizes = [2, 512], strides = [1, 1]} : vector<8x512xf32> to vector<2x512xf32>
      %53 = vector.shape_cast %52 : vector<2x512xf32> to vector<1x2x512xf32>
      %cst_16 = arith.constant dense<0.000000e+00> : vector<1xf32>
      %54 = vector.multi_reduction <add>, %53, %cst_16 [1, 2] : vector<1x2x512xf32> to vector<1xf32>
      %55 = vector.shape_cast %54 : vector<1xf32> to vector<1x1x1xf32>
      %56 = vector.extract %55[0, 0, 0] : f32 from vector<1x1x1xf32>
      %57 = vector.broadcast %56 : f32 to vector<1x1xf32>
      %c3_i32 = arith.constant 3 : i32
      %58 = vector.broadcast %c3_i32 : i32 to vector<1x128xi32>
      %59 = arith.cmpi eq, %17, %58 : vector<1x128xi32>
      %60 = vector.shape_cast %57 : vector<1x1xf32> to vector<1x1xf32>
      %61 = vector.broadcast %60 : vector<1x1xf32> to vector<1x128xf32>
      %62 = arith.select %59, %61, %51 : vector<1x128xi1>, vector<1x128xf32>
      %c0_17 = arith.constant 0 : index
      %c0_18 = arith.constant 0 : index
      %c0_19 = arith.constant 0 : index
      %63 = vector.load %arg3[%c0_17, %c0_18, %c0_19] : memref<1x1x128xf32, #tpu.memory_space<vmem>>, vector<1x1x128xf32>
      %64 = vector.shape_cast %63 : vector<1x1x128xf32> to vector<1x128xf32>
      %65 = vector.shape_cast %62 : vector<1x128xf32> to vector<1x1x128xf32>
      tpu.vector_store %arg3[%c0_17, %c0_18, %c0_19], %65 {strides = array<i32>} : memref<1x1x128xf32, #tpu.memory_space<vmem>>, vector<1x1x128xf32>,
    } else {
    }
    return
  }
  func.func @transform_0(%arg0: i32, %arg1: i32) -> (i32, i32) {
    %c2_i32 = arith.constant 2 : i32
    %0 = arith.muli %arg0, %c2_i32 : i32
    %1 = arith.addi %0, %arg1 : i32
    %c3_i32 = arith.constant 3 : i32
    %2 = arith.minsi %1, %c3_i32 : i32
    %c0_i32 = arith.constant 0 : i32
    %c0_i32_0 = arith.constant 0 : i32
    return %c0_i32, %2 : i32, i32
  }
  func.func @transform_1(%arg0: i32, %arg1: i32) -> (i32, i32, i32) {
    %c0_i32 = arith.constant 0 : i32
    %c0_i32_0 = arith.constant 0 : i32
    %c0_i32_1 = arith.constant 0 : i32
    return %arg0, %c0_i32, %c0_i32_0 : i32, i32, i32
  }
}

</mosaic_0001>

<bundles_post_ra>
// kernel: tpu_custom_call.1
= control target key start
LH: loop header
LB: loop body
LE: loop exit
PB: predicated region body
PF: predicated region fallthrough
CT: control target
= control target key end

     0   :  { %6 = vsyncpa [#allocation4], 0  ;;  %s942_s0 = inlined_call_operand.hbm [shape: f32[8,2048], index: 0, kind: input, shape index: {}]   ;;  %s943_s1 = inlined_call_operand.hbm [shape: f32[2,1,128], index: 1, kind: output, shape index: {}]  }
   0x1   :  { %8 = vsyncpa [#allocation4 + $0x1], 0 }
   0x2   :  { %9 = vsyncpa [#allocation5], 0 }
   0x3   :  { %11 = vsyncpa [#allocation5 + $0x1], 0  ;;  %s695_s6 = smov 0   ;;  %s697_s7 = smov 0  }
   0x4   :  { %s699_s8 = smov 0   ;;  %s701_s9 = smov 0  }
   0x5   :  { %s703_s10 = smov 0   ;;  %s705_s11 = smov 0  }
   0x6   :  { %s707_s12 = smov 0   ;;  %s709_s13 = smov 0  }
   0x7   :  { %s711_s14 = smov 0   ;;  %s713_s15 = smov 0  }
   0x8   :  { %s715_s16 = smov 0  }
   0x9 LB: > { %s399_s17 = sadd.s32 4294967295, %s680_s16   ;;  %s400_s18 = sadd.s32 4294967294, %s680_s16   ;;  %s680_s16 = sphi %s715_s16, %s17_s16   ;;  %s676_s15 = sphi %s713_s15, %s963_s15   ;;  %s672_s14 = sphi %s711_s14, %s962_s14   ;;  %s668_s13 = sphi %s709_s13, %s961_s13   ;;  %s664_s12 = sphi %s707_s12, %s960_s12   ;;  %s660_s11 = sphi %s705_s11, %s959_s11   ;;  %s656_s10 = sphi %s703_s10, %s958_s10   ;;  %s652_s9 = sphi %s701_s9, %s957_s9   ;;  %s648_s8 = sphi %s699_s8, %s956_s8   ;;  %s644_s7 = sphi %s697_s7, %s955_s7   ;;  %s640_s6 = sphi %s695_s6, %s954_s6  }
   0xa   : > { %s26_s19 = sadd.s32 1, %s672_s14  ;;  %s29_s20 = sadd.s32 1, %s676_s15 }
   0xb   : > { %p27_p0 = scmp.ge.s32.totalorder %s26_s19, 2  ;;  %s401_s21 = sshll.u32 %s676_s15, 1 }
   0xc   : > { %s34_s22 = sadd.s32 %s672_s14, %s401_s21  ;;  %s44_s23 = sadd.s32 1, %s660_s11 }
   0xd   : > { %s965_s19 = smov (%p27_p0, %s26_s19), 0  ;;  %s967_s20 = smov (!%p27_p0, %s29_s20), %s676_s15 }
   0xe   : > { %p35_p1 = scmp.lt.s32.totalorder %s34_s22, 3  ;;  %p51_p2 = scmp.ne.s32.totalorder %s660_s11, %s656_s10 }
   0xf   : > { %p31_p3 = scmp.ge.s32.totalorder %s967_s20, 2  ;;  %p52_p4 = scmp.eq.s32.totalorder %s680_s16, 0 }
  0x10   : > { %s969_s22 = smov (!%p35_p1, %s34_s22), 3  ;;  %p57_p6 = scmp.ne.s32.totalorder %s656_s10, %s652_s9 }
  0x11   : > { %s971_s20 = smov (%p31_p3, %s967_s20), 0  ;;  %p765_p5 = por %p52_p4, %p51_p2 }
  0x12   : > { %s402_s25 = sshll.u32 %s971_s20, 1  ;;  %p58_p7 = scmp.eq.s32.totalorder %s399_s17, 0 }
  0x13   : > { %s38_s26 = sadd.s32 %s402_s25, %s965_s19  ;;  %s67_s27 = ssub.s32 %s676_s15, %s971_s20 }
  0x14   : > { %p39_p8 = scmp.lt.s32.totalorder %s38_s26, 3  ;;  %p777_p9 = por %p58_p7, %p57_p6 }
  0x15   : > { %p68_p10 = scmp.eq.s32.totalorder %s67_s27, 0  ;;  %s70_s29 = sadd.s32 1, %s648_s8 }
  0x16   : > { %s973_s26 = smov (!%p39_p8, %s38_s26), 3  ;;  %p80_p11 = scmp.ne.s32.totalorder %s648_s8, %s644_s7 }
  0x17   : > { %s783_s30 = scalar_select %p68_p10, %s648_s8, %s70_s29  }
  0x18   : > { %s41_s2 = ssub.s32 %s969_s22, %s973_s26  ;;  %p81_p13 = scmp.eq.s32.totalorder %s399_s17, 3 }
  0x19   : > { %p42_p12 = scmp.eq.s32.totalorder %s41_s2, 0  ;;  %p86_p0 = scmp.ne.s32.totalorder %s644_s7, %s640_s6 }
  0x1a   : > { %p87_p1 = scmp.eq.s32.totalorder %s400_s18, 3  ;;  %p796_p2 = por %p81_p13, %p80_p11 }
  0x1b   : > { %s794_s3 = scalar_select %p42_p12, %s660_s11, %s44_s23  }
  0x1c   : > { %s947_s4 = scalar_select %p796_p2, 1, 0 }
  0x1d   : > { %p800_p3 = por %p87_p1, %p86_p0  ;;  %p437_p4 = scmp.lt.s32.totalorder %s680_s16, 4 }
  0x1e   : > { %s107_s9 = sand.u32 1, %s660_s11   ;;  %s416_s21 = sshll.u32 %s969_s22, 9 }
  0x1f   : > { %s948_s5 = scalar_select %p800_p3, 1, 0 }
  0x20   : > { %s405_s25 = sshll.u32 %s107_s9, 5  ;;  %s809_s27 = scalar_lea.hbm %s942_s0, %s416_s21 }
  0x21   : > { %s111_s18 = scalar_lea.vmem [#allocation3], %s405_s25  ;;  %p813_p6 = pnand %p437_p4, %p765_p5 }
  0x22   : > { %s123_s23 = sshll.u32 %s111_s18, 4  ;;  %s108_s22 = scalar_lea.sflag [#allocation4], %s107_s9  ;;  %s817_s23 = int_to_ptr.vmem [resolvable:$true] %s123_s23 }
  0x23   : > { %s528_s2 = scalar_lea.hbm %s809_s27, 512  ;;  %p530_p11 = pneg %p813_p6 }
  0x24   : > { %p529_p10 = scmp.ne.s32.totalorder %s809_s27, %s528_s2  ;;  %s533_s25 = scalar_lea.hbm %s942_s0, 2048 }
  0x25   : > { %p534_p5 = scmp.lt.u32.totalorder %s809_s27, %s942_s0  ;;  %p535_p0 = scmp.lt.u32.totalorder %s533_s25, %s528_s2 }
  0x26   : > { %p531_p12 = pnand %p530_p11, %p529_p10  ;;  %p537_p4 = scmp.lt.u32.totalorder %s528_s2, %s809_s27 }
  0x27   : > { %p536_p1 = por %p535_p0, %p534_p5 }
  0x28   : > { %p532_p13 = pneg %p531_p12 }
  0x29   : > { %p538_p7 = por %p537_p4, %p536_p1 }
  0x2b   : > { %p539_p8 = pnand %p538_p7, %p532_p13 }
  0x2d   : > { %542 = shalt.err (!%p539_p8)
}
  0x2e   : > { %s543_s9 = scalar_lea.vmem %s817_s23, 512  ;;  %s682_s18 = smov [#allocation3]  }
  0x2f   : > { %p544_p10 = scmp.ne.s32.totalorder %s817_s23, %s543_s9  ;;  %s548_s24 = sshll.u32 %s682_s18, 4  ;;  %s549_s24 = int_to_ptr.vmem [resolvable:$false] %s548_s24 }
  0x30   : > { %s550_s21 = scalar_lea.vmem %s549_s24, 1024  ;;  %p551_p2 = scmp.lt.s32.totalorder %s817_s23, %s549_s24 }
  0x31   : > { %p546_p12 = pnand %p544_p10, %p530_p11  ;;  %p552_p5 = scmp.lt.s32.totalorder %s550_s21, %s543_s9 }
  0x33   : > { %p547_p3 = pneg %p546_p12  ;;  %p553_p0 = por %p552_p5, %p551_p2 }
  0x35   : > { %p554_p1 = pnand %p553_p0, %p547_p3 }
  0x37   : > { %557 = shalt.err (!%p554_p1)
}
  0x38   : > { %432 = dma.hbm_to_vmem [thread:$0]  (!%p813_p6), %s809_s27, 512, %s817_s23, %s108_s22  }
  0x39   : > { %p950_p7 = scmp.lt.s32.totalorder %s680_s16, 5  ;;  %p951_p8 = scmp.ge.s32.totalorder %s680_s16, 1 }
  0x3b   : > { %p129_p11 = pnand %p951_p8, %p950_p7 }
  0x3c   : > { %s134_s2 = sand.u32 (!%p129_p11), 1, %s656_s10  }
  0x3d   : > { %132 = sbr.rel (%p129_p11) target bundleno = 338 (0x152), region = 24  ;;  %s410_s25 = sshll.u32 (!%p129_p11), %s134_s2, 5 }
  0x3e   : > { %s135_s26 = scalar_lea.sflag (!%p129_p11), [#allocation4], %s134_s2  ;;  %s138_s17 = scalar_lea.vmem (!%p129_p11), [#allocation3], %s410_s25 }
  0x44   : > { %631 = dma.done.wait (%p777_p9), %s135_s26, 512  }
  0x45   : > { %633 = vsyncadd (%p777_p9), %s135_s26, 4294966784  ;;  %s154_s29 = sand.u32 1, %s644_s7   ;;  %p411_p2 = scmp.ne.s32.totalorder %s664_s12, 0 }
  0x46   : > { %s858_s27 = scalar_lea.vmem [#allocation6], %s154_s29  ;;  %v683_v0 = vmov (!%p411_p2), 0.0  }
  0x47   : > { %164 = sbr.rel (%p411_p2) target bundleno = 78 (0x4e), region = 32  ;;  %165 = vst [vmem:[#allocation2] sm:$0xff] (!%p411_p2), %v683_v0  ;;  %166 = vst [vmem:[#allocation2 + $0x8] sm:$0xff] (!%p411_p2), %v683_v0 }
  0x48   : > { %167 = vst [vmem:[#allocation2 + $0x10] sm:$0xff] (!%p411_p2), %v683_v0  ;;  %168 = vst [vmem:[#allocation2 + $0x18] sm:$0xff] (!%p411_p2), %v683_v0 }
  0x4e PF: > { %v169_v1 = vld [vmem:[%s138_s17] sm:$0xff]  ;;  %v170_v3 = vld [vmem:[%s138_s17 + $0x8] sm:$0xff]  ;;  %v171_v7 = vld [vmem:[%s138_s17 + $0x10] sm:$0xff]  ;;  %p412_p9 = scmp.ne.s32.totalorder %s664_s12, 1 }
  0x4f   : > { %v181_v2 = vld [vmem:[#allocation2] sm:$0xff]  ;;  %v173_v4 = vmul.f32 %v169_v1, %v169_v1  ;;  %v174_v5 = vmul.f32 %v170_v3, %v170_v3  ;;  %v182_v6 = vld [vmem:[#allocation2 + $0x8] sm:$0xff]  ;;  %v183_v8 = vld [vmem:[#allocation2 + $0x10] sm:$0xff]  ;;  %v175_v9 = vmul.f32 %v171_v7, %v171_v7  ;;  %vm203_vm0 = vcmask (!%p412_p9), 1041408  }
  0x50   : > { %v172_v10 = vld [vmem:[%s138_s17 + $0x18] sm:$0xff]  ;;  %196 = sbr.rel (%p412_p9) target bundleno = 313 (0x139), region = 36 }
  0x51   : > { %v184_v11 = vld [vmem:[#allocation2 + $0x18] sm:$0xff]  ;;  %v185_v12 = vadd.f32 %v181_v2, %v173_v4  ;;  %v186_v13 = vadd.f32 %v182_v6, %v174_v5  ;;  %v176_v14 = vmul.f32 %v172_v10, %v172_v10  ;;  %v187_v15 = vadd.f32 %v183_v8, %v175_v9 }
  0x53   : > { %189 = vst [vmem:[#allocation2] sm:$0xff] %v185_v12  ;;  %190 = vst [vmem:[#allocation2 + $0x8] sm:$0xff] %v186_v13  ;;  %v188_v16 = vadd.f32 %v184_v11, %v176_v14 }
  0x54   : > { %191 = vst [vmem:[#allocation2 + $0x10] sm:$0xff] %v187_v15 }
  0x55   : > { %192 = vst [vmem:[#allocation2 + $0x18] sm:$0xff] %v188_v16 }
  0x5a   : > { %v197_v17 = vld [vmem:[#allocation2] sm:$0xff]  ;;  %v198_v18 = vld [vmem:[#allocation2 + $0x8] sm:$0xff] }
  0x5b   : > { %v199_v19 = vld [vmem:[#allocation2 + $0x10] sm:$0xff]  ;;  %v204_v21 = vsel %vm203_vm0, %v197_v17, 0.0  ;;  %v205_v22 = vsel %vm203_vm0, %v198_v18, 0.0  ;;  %v254_v24 = vrot.slane %v197_v17, 4  ;;  %v255_v27 = vrot.slane %v198_v18, 4 }
  0x5c   : > { %v200_v20 = vld [vmem:[#allocation2 + $0x18] sm:$0xff]  ;;  %v207_v23 = vsel %vm203_vm0, %v199_v19, 0.0  ;;  %v206_v25 = vadd.f32 %v205_v22, %v204_v21  ;;  %v256_v28 = vrot.slane %v199_v19, 4  ;;  %v227_v31 = vrot.slane %v197_v17, 2 }
  0x5d   : > { %v209_v26 = vsel %vm203_vm0, %v200_v20, 0.0  ;;  %v257_v29 = vrot.slane %v200_v20, 4  ;;  %v262_v30 = vsel %vm203_vm0, %v254_v24, 0.0  ;;  %v228_v32 = vrot.slane %v198_v18, 2 }
  0x5e   : > { %v208_v33 = vadd.f32 %v207_v23, %v206_v25  ;;  %v263_v34 = vsel %vm203_vm0, %v255_v27, 0.0  ;;  %v265_v35 = vsel %vm203_vm0, %v256_v28, 0.0  ;;  %v229_v36 = vrot.slane %v199_v19, 2 }
  0x5f   : > { %v264_v37 = vadd.f32 %v263_v34, %v262_v30  ;;  %v267_v38 = vsel %vm203_vm0, %v257_v29, 0.0  ;;  %v230_v39 = vrot.slane %v200_v20, 2  ;;  %v235_v40 = vsel %vm203_vm0, %v227_v31, 0.0 }
  0x60   : > { %v210_v41 = vadd.f32 %v209_v26, %v208_v33  ;;  %v236_v42 = vsel %vm203_vm0, %v228_v32, 0.0  ;;  %v238_v43 = vsel %vm203_vm0, %v229_v36, 0.0  ;;  %v281_v44 = vrot.slane %v197_v17, 6 }
  0x61   : > { %v266_v45 = vadd.f32 %v265_v35, %v264_v37  ;;  %v237_v46 = vadd.f32 %v236_v42, %v235_v40  ;;  %v282_v47 = vrot.slane %v198_v18, 6  ;;  %v240_v48 = vsel %vm203_vm0, %v230_v39, 0.0 }
  0x62   : > { %211 = vadd.xlane.f32.xlu0 %v210_v41  ;;  %v283_v49 = vrot.slane %v199_v19, 6  ;;  %v284_v50 = vrot.slane %v200_v20, 6  ;;  %v289_v51 = vsel %vm203_vm0, %v281_v44, 0.0  ;;  %v201_v25 = vlaneseq }
  0x63   : > { %v268_v52 = vadd.f32 %v267_v38, %v266_v45  ;;  %v239_v53 = vadd.f32 %v238_v43, %v237_v46  ;;  %v290_v54 = vsel %vm203_vm0, %v282_v47, 0.0 }
  0x64   : > { %v291_v55 = vadd.f32 %v290_v54, %v289_v51  ;;  %v292_v56 = vsel %vm203_vm0, %v283_v49, 0.0  ;;  %v294_v58 = vsel %vm203_vm0, %v284_v50, 0.0  ;;  %v202_v26 = vand.u32 127, %v201_v25 }
  0x65   : > { %269 = vadd.xlane.f32.xlu1 %v268_v52  ;;  %v241_v57 = vadd.f32 %v240_v48, %v239_v53 }
  0x66   : > { %v293_v59 = vadd.f32 %v292_v56, %v291_v55  ;;  %vm220_vm1 = vcmp.eq.s32.totalorder %v202_v26, 0  ;;  %vm251_vm2 = vcmp.eq.s32.totalorder %v202_v26, 1  ;;  %vm278_vm3 = vcmp.eq.s32.totalorder %v202_v26, 2 }
  0x67   : > { %242 = vadd.xlane.f32.xlu0 %v241_v57  ;;  %vm305_vm4 = vcmp.eq.s32.totalorder %v202_v26, 3 }
  0x68   : > { %v295_v60 = vadd.f32 %v294_v58, %v293_v59 }
  0x6a   : > { %296 = vadd.xlane.f32.xlu1 %v295_v60 }
  0xef   : > { %v212_v61 = vpop.xlane.xlu0 %211 }
  0xf0   : > { %v213_v62 = vrot.slane %v212_v61, 4 }
  0xf2   : > { %v214_v63 = vadd.f32 %v213_v62, %v212_v61  ;;  %v270_v0 = vpop.xlane.xlu1 %269 }
  0xf3   : > { %v271_v1 = vrot.slane %v270_v0, 4 }
  0xf4   : > { %v215_v2 = vrot.slane %v214_v63, 2  ;;  %v243_v3 = vpop.xlane.xlu0 %242 }
  0xf5   : > { %v272_v4 = vadd.f32 %v271_v1, %v270_v0  ;;  %v244_v5 = vrot.slane %v243_v3, 4 }
  0xf6   : > { %v216_v6 = vadd.f32 %v215_v2, %v214_v63 }
  0xf7   : > { %v273_v7 = vrot.slane %v272_v4, 2  ;;  %v245_v8 = vadd.f32 %v244_v5, %v243_v3  ;;  %v297_v9 = vpop.xlane.xlu1 %296 }
  0xf8   : > { %v298_v10 = vrot.slane %v297_v9, 4  ;;  %v217_v11 = vrot.slane %v216_v6, 1 }
  0xf9   : > { %v246_v12 = vrot.slane %v245_v8, 2  ;;  %v274_v13 = vadd.f32 %v273_v7, %v272_v4 }
  0xfa   : > { %v299_v14 = vadd.f32 %v298_v10, %v297_v9  ;;  %v218_v15 = vadd.f32 %v217_v11, %v216_v6 }
  0xfb   : > { %v247_v16 = vadd.f32 %v246_v12, %v245_v8  ;;  %v275_v18 = vrot.slane %v274_v13, 1 }
  0xfc   : > { %v300_v17 = vrot.slane %v299_v14, 2  ;;  %417 = vpush %v218_v15 }
  0xfd   : > { %v248_v19 = vrot.slane %v247_v16, 1  ;;  %v276_v22 = vadd.f32 %v275_v18, %v274_v13 }
  0xfe   : > { %v301_v20 = vadd.f32 %v300_v17, %v299_v14 }
  0xff   : > { %v249_v21 = vadd.f32 %v248_v19, %v247_v16 }
 0x100   : > { %v302_v23 = vrot.slane %v301_v20, 1 }
 0x101   : > { %419 = vpush %v249_v21 }
 0x102   : > { %421 = vpush %v276_v22  ;;  %v303_v24 = vadd.f32 %v302_v23, %v301_v20 }
 0x104   : > { %423 = vpush %v303_v24 }
 0x12d   : > { %s418_s12 = spop %417 }
 0x12e   : > { %v221_v27 = vstv %s418_s12 }
 0x12f   : > { %v222_v28 = vsel %vm220_vm1, %v221_v27, 0.0 }
 0x132   : > { %s420_s28 = spop %419 }
 0x133   : > { %v252_v29 = vstv %s420_s28  ;;  %s422_s23 = spop %421 }
 0x134   : > { %v253_v30 = vsel %vm251_vm2, %v252_v29, %v222_v28  ;;  %v279_v31 = vstv %s422_s23 }
 0x135   : > { %v280_v32 = vsel %vm278_vm3, %v279_v31, %v253_v30  ;;  %s424_s22 = spop %423 }
 0x136   : > { %v306_v33 = vstv %s424_s22 }
 0x137   : > { %v307_v34 = vsel %vm305_vm4, %v306_v33, %v280_v32 }
 0x138   : > { %308 = vst [vmem:[%s858_s27] sm:$0x1] %v307_v34 }
 0x139 PF: > { %s413_s9 = sshll.u32 %s668_s13, 4  ;;  %s322_s2 = sshll.u32 %s858_s27, 4  ;;  %s323_s2 = int_to_ptr.vmem [resolvable:$true] %s322_s2 }
 0x13a   : > { %s883_s21 = scalar_lea.hbm %s943_s1, %s413_s9  ;;  %s310_s25 = scalar_lea.sflag [#allocation5], %s154_s29 }
 0x13b   : > { %s558_s26 = scalar_lea.vmem %s323_s2, 16  ;;  %p952_p6 = scmp.ne.s32.totalorder %s947_s4, 0 }
 0x13c   : > { %p559_p3 = scmp.ne.s32.totalorder %s323_s2, %s558_s26  ;;  %s684_s17 = smov [#allocation6]  }
 0x13d   : > { %s562_s12 = sshll.u32 %s684_s17, 4  ;;  %s563_s12 = int_to_ptr.vmem [resolvable:$false] %s562_s12 }
 0x13e   : > { %p560_p13 = pnand %p559_p3, %p952_p6  ;;  %s564_s28 = scalar_lea.vmem %s563_s12, 32 }
 0x13f   : > { %p565_p10 = scmp.lt.s32.totalorder %s323_s2, %s563_s12  ;;  %p566_p12 = scmp.lt.s32.totalorder %s564_s28, %s558_s26 }
 0x140   : > { %p561_p4 = pneg %p560_p13 }
 0x141   : > { %p567_p5 = por %p566_p12, %p565_p10 }
 0x143   : > { %p568_p0 = pnand %p567_p5, %p561_p4 }
 0x145   : > { %571 = shalt.err (!%p568_p0)
}
 0x146   : > { %s572_s13 = scalar_lea.hbm %s883_s21, 16  ;;  %s576_s23 = scalar_lea.hbm %s943_s1, 32 }
 0x147   : > { %p573_p1 = scmp.ne.s32.totalorder %s883_s21, %s572_s13  ;;  %p577_p11 = scmp.lt.u32.totalorder %s883_s21, %s943_s1 }
 0x148   : > { %p578_p2 = scmp.lt.u32.totalorder %s576_s23, %s572_s13  ;;  %p580_p3 = scmp.lt.u32.totalorder %s572_s13, %s883_s21 }
 0x149   : > { %p574_p7 = pnand %p573_p1, %p952_p6 }
 0x14a   : > { %p579_p9 = por %p578_p2, %p577_p11 }
 0x14b   : > { %p575_p8 = pneg %p574_p7 }
 0x14c   : > { %p581_p13 = por %p580_p3, %p579_p9 }
 0x14e   : > { %p582_p4 = pnand %p581_p13, %p575_p8 }
 0x150   : > { %585 = shalt.err (!%p582_p4)
}
 0x151   : > { %427 = dma.vmem_to_hbm [thread:$0]  (%p952_p6), %s323_s2, 16, %s883_s21, %s310_s25  }
 0x152 PF: > { %p438_p10 = scmp.ge.s32.totalorder %s680_s16, 2  ;;  %s334_s18 = sand.u32 1, %s640_s6  }
 0x153   : > { %p953_p12 = scmp.ne.s32.totalorder %s948_s5, 0  ;;  %s335_s24 = scalar_lea.sflag [#allocation5], %s334_s18 }
 0x155   : > { %p434_p5 = pnand %p438_p10, %p953_p12 }
 0x157   : > { %635 = dma.done.wait (!%p434_p5), %s335_s24, 16  }
 0x158   : > { %637 = vsyncadd (!%p434_p5), %s335_s24, 4294967280  ;;  %s17_s16 = sadd.s32 1, %s680_s16   ;;  %s954_s6 = smov %s644_s7 }
 0x159   : > { %p14_p0 = scmp.ge.s32.totalorder %s17_s16, 6   ;;  %s955_s7 = smov %s648_s8 }
 0x15a   : > { %s956_s8 = smov %s783_s30  ;;  %s957_s9 = smov %s656_s10 }
 0x15b   : > { %s958_s10 = smov %s660_s11  ;;  %s959_s11 = smov %s794_s3 }
 0x15c   : > { %s960_s12 = smov %s672_s14  ;;  %s961_s13 = smov %s676_s15 }
 0x15d   : > { %s962_s14 = smov %s965_s19  ;;  %s963_s15 = smov %s971_s20 }
 0x15e   :  { %16 = sbr.rel (!%p14_p0) target bundleno = 9 (0x9), region = 77 }
 0x165   :  { %339 = vsyncpa [#allocation4], 1 }
 0x166   :  { %341 = vsyncpa [#allocation4 + $0x1], 1 }
 0x167   :  { %342 = vsyncpa [#allocation5], 1 }
 0x168   :  { %344 = vsyncpa [#allocation5 + $0x1], 1 }

</bundles_post_ra>
